<compile_context>
chip_gen: v7x
topology: tpu7x:2x2x1
jax: 0.10.0
libtpu: 0.0.40
codegen_flags: <defaults>
</compile_context>

<pallas_src>
import math
import functools

import jax
import jax.numpy as jnp
from jax import lax
from jax.experimental import pallas as pl
from jax.experimental.pallas import tpu as pltpu


# ----------------------------- in-kernel helpers -----------------------------

_LN_EPS = 1e-12
# Finite stand-in for the module's masked_fill(-inf): probabilities match the reference
# (up to the approx-reciprocal tolerance, ~1e-4 rel) whenever >=1 key is unmasked; a
# fully-masked row yields a uniform distribution instead of the reference's NaNs
# (deliberate divergence).
_MASK_VALUE = -1e30


def _layer_norm(x, gamma, beta, eps=_LN_EPS):
    mu = jnp.mean(x, axis=-1, keepdims=True)
    var = jnp.mean((x - mu) ** 2, axis=-1, keepdims=True)
    return (x - mu) * lax.rsqrt(var + eps) * gamma + beta


def _gelu_exact(x):
    # nn.GELU() default = exact erf formulation.
    # TODO(synk): on v5e (no bf16 VPU) consider tanh-approx GELU to move work to the EUP.
    return 0.5 * x * (1.0 + lax.erf(x * (1.0 / math.sqrt(2.0))))


# ------------------------------- Pallas kernels -------------------------------

def embed_ln_kernel(x_ref, g_ref, b_ref, o_ref):
    o_ref[...] = _layer_norm(x_ref[...], g_ref[...], b_ref[...])


def bert_layer_kernel(x_ref, bias_ref,
                      wq_ref, bq_ref, wkv_ref, bkv_ref,
                      wo_ref, bo_ref, g1_ref, be1_ref,
                      w1_ref, b1_ref, w2_ref, b2_ref,
                      g2_ref, be2_ref,
                      o_ref, kh_sc, vh_sc,
                      *, num_heads, head_size, seq_tile):
    nh, d, ts = num_heads, head_size, seq_tile
    S, H = x_ref.shape
    si = pl.program_id(1)

    # --- K/V projection once per batch element (si == 0), stored head-split in bf16 ---
    @pl.when(si == 0)
    def _():
        xs_b = x_ref[...].astype(jnp.bfloat16)
        kv = jnp.dot(xs_b, wkv_ref[...], preferred_element_type=jnp.float32) + bkv_ref[...]
        k, v = kv[:, :H], kv[:, H:]
        # TODO(synk): use pltpu.einshape for the head split/merge when head_size >= 128.
        kh_sc[...] = jnp.stack([k[:, h * d:(h + 1) * d] for h in range(nh)],
                               axis=0).astype(jnp.bfloat16)
        vh_sc[...] = jnp.stack([v[:, h * d:(h + 1) * d] for h in range(nh)],
                               axis=0).astype(jnp.bfloat16)

    # --- query tile sliced from the resident full-sequence block (no duplicate x input) ---
    q0 = pl.multiple_of(si * ts, ts)
    xq = x_ref[pl.ds(q0, ts), :]                                    # (ts, H) f32 residual
    q = jnp.dot(xq.astype(jnp.bfloat16), wq_ref[...],
                preferred_element_type=jnp.float32) + bq_ref[...]
    q = q * (1.0 / math.sqrt(d))                                    # fold 1/sqrt(d) into q
    qh = jnp.stack([q[:, h * d:(h + 1) * d] for h in range(nh)],
                   axis=0).astype(jnp.bfloat16)                     # (nh, ts, d)

    kh = kh_sc[...]                                                 # (nh, S, d) bf16
    vh = vh_sc[...]

    # --- attention: heads batched into one einsum pair, f32 accumulation ---
    s = jnp.einsum('nqd,nkd->nqk', qh, kh, preferred_element_type=jnp.float32)  # (nh, ts, S)
    s = s + bias_ref[...][None]                                     # additive key-mask bias
    s = s - jnp.max(s, axis=-1, keepdims=True)
    s = jnp.exp(s)
    p = (s * pl.reciprocal(jnp.sum(s, axis=-1, keepdims=True), approx=True)
         ).astype(jnp.bfloat16)
    # attention-prob dropout is identity (eval mode)
    a = jnp.einsum('nqk,nkd->nqd', p, vh, preferred_element_type=jnp.float32)   # (nh, ts, d)
    a = jnp.concatenate([a[h] for h in range(nh)], axis=-1)                     # (ts, H)

    # --- attention output projection + residual + LN1 ---
    a = jnp.dot(a.astype(jnp.bfloat16), wo_ref[...],
                preferred_element_type=jnp.float32) + bo_ref[...]
    a = _layer_norm(a + xq, g1_ref[...], be1_ref[...])

    # --- MLP (GELU) + residual + LN2 ---
    h1 = jnp.dot(a.astype(jnp.bfloat16), w1_ref[...],
                 preferred_element_type=jnp.float32) + b1_ref[...]
    h1 = _gelu_exact(h1)
    m = jnp.dot(h1.astype(jnp.bfloat16), w2_ref[...],
                preferred_element_type=jnp.float32) + b2_ref[...]
    o_ref[...] = _layer_norm(m + a, g2_ref[...], be2_ref[...])


def pooler_kernel(x_ref, w_ref, b_ref, o_ref):
    x0 = x_ref[:, 0, :].astype(jnp.bfloat16)            # CLS token, (B, H)
    y = jnp.dot(x0, w_ref[...], preferred_element_type=jnp.float32) + b_ref[...]
    o_ref[...] = jnp.tanh(y)


# ------------------------------- Pallas wrappers -------------------------------

def _device_caps():
    kind = ""
    try:
        kind = jax.devices()[0].device_kind.lower()
    except Exception:
        pass
    if "v7" in kind:                                     # v7x: 64 MiB VMEM per TensorCore
        return {"vmem_cap": 56 * 2 ** 20, "seq_tile": 256}
    return {"vmem_cap": 100 * 2 ** 20, "seq_tile": 512}  # v5e/v6e: 128 MiB physical VMEM


def embed_ln(x, g, b, *, row_tile=512):
    B, S, H = x.shape
    N = B * S
    x2 = x.reshape(N, H)
    # full dim or a multiple of 8; a partial last block is LayerNorm'd per-row and the
    # out-of-range rows are discarded on the masked writeback.
    tm = N if N <= row_tile else row_tile
    y = pl.pallas_call(
        embed_ln_kernel,
        grid=(pl.cdiv(N, tm),),
        in_specs=[pl.BlockSpec((tm, H), lambda i: (i, 0)),
                  pl.BlockSpec((1, H), lambda i: (0, 0)),
                  pl.BlockSpec((1, H), lambda i: (0, 0))],
        out_specs=pl.BlockSpec((tm, H), lambda i: (i, 0)),
        out_shape=jax.ShapeDtypeStruct((N, H), jnp.float32),
        compiler_params=pltpu.CompilerParams(dimension_semantics=("parallel",)),
    )(x2, g, b)
    return y.reshape(B, S, H)


def _layer_vmem_limit(S, ts, H, I, nh, d, *, buffered_weights, cap):
    bf16, f32 = 2, 4
    lane = lambda n: -(-n // 128) * 128
    sub = lambda n: -(-n // 8) * 8
    wmult = 1 if buffered_weights else 2
    weights = (H * H + H * 2 * H + H * H + H * I + I * H) * bf16 * wmult
    smalls = (H + 2 * H + H + I + 5 * H) * f32 * wmult
    # pipelined I/O blocks: x (S,H) + bias (1,S) inputs, out (ts,H); 2x double-buffering
    io = 2 * f32 * (sub(S) * lane(H) + sub(1) * lane(S) + sub(ts) * lane(H))
    # persistent K/V head scratch (bf16, lane-padded)
    kv_scratch = 2 * nh * sub(S) * lane(d) * bf16
    # transient activations: kv proj, score/exp/prob staging, per-head attn out, mlp, misc
    acts = f32 * (S * 2 * H + 3 * nh * ts * S + nh * ts * lane(d) + ts * I + 6 * ts * H)
    est = int(1.4 * (weights + smalls + io + kv_scratch + acts))
    return int(min(cap, max(24 * 2 ** 20, est)))


def _weight_spec(shape, buffered):
    n = len(shape)
    idx = lambda b, s: (0,) * n
    if buffered:
        # constant index map -> never re-fetched; single-buffer to halve resident VMEM
        return pl.BlockSpec(shape, idx, pipeline_mode=pl.Buffered(1))
    return pl.BlockSpec(shape, idx)


def _bert_layer_call(x, bias3, p, *, num_heads, head_size, seq_tile,
                     buffered_weights, vmem_cap):
    B, S, H = x.shape
    I = p["w1"].shape[1]
    d = head_size
    ts = S if S <= seq_tile else seq_tile
    if S % ts != 0:
        ts = S          # avoid partial query tiles (keeps the in-kernel pl.ds in bounds)
    nt = pl.cdiv(S, ts)

    rep = functools.partial(_weight_spec, buffered=buffered_weights)
    in_specs = [
        pl.BlockSpec((pl.Squeezed(), S, H), lambda b, s: (b, 0, 0)),   # x (full seq, resident)
        pl.BlockSpec((pl.Squeezed(), 1, S), lambda b, s: (b, 0, 0)),   # additive mask bias
        rep((H, H)), rep((1, H)),            # Wq, bq
        rep((H, 2 * H)), rep((1, 2 * H)),    # fused [Wk|Wv], [bk|bv]
        rep((H, H)), rep((1, H)),            # Wo, bo
        rep((1, H)), rep((1, H)),            # ln1 gamma/beta
        rep((H, I)), rep((1, I)),            # mlp W1, b1
        rep((I, H)), rep((1, H)),            # mlp W2, b2
        rep((1, H)), rep((1, H)),            # ln2 gamma/beta
    ]
    kernel = functools.partial(bert_layer_kernel, num_heads=num_heads,
                               head_size=head_size, seq_tile=ts)
    return pl.pallas_call(
        kernel,
        grid=(B, nt),
        in_specs=in_specs,
        out_specs=pl.BlockSpec((pl.Squeezed(), ts, H), lambda b, s: (b, s, 0)),
        out_shape=jax.ShapeDtypeStruct((B, S, H), jnp.float32),
        scratch_shapes=[pltpu.VMEM((num_heads, S, d), jnp.bfloat16),   # K heads
                        pltpu.VMEM((num_heads, S, d), jnp.bfloat16)],  # V heads
        compiler_params=pltpu.CompilerParams(
            # batch is the only parallel axis (v7x megacore shards batches); the
            # query-tile axis is "arbitrary" because the K/V scratch carries across it.
            dimension_semantics=("parallel", "arbitrary"),
            vmem_limit_bytes=_layer_vmem_limit(S, ts, H, I, num_heads, d,
                                               buffered_weights=buffered_weights,
                                               cap=vmem_cap)),
    )(x, bias3,
      p["wq"], p["bq"], p["wkv"], p["bkv"],
      p["wo"], p["bo"], p["ln1_g"], p["ln1_b"],
      p["w1"], p["b1"], p["w2"], p["b2"],
      p["ln2_g"], p["ln2_b"])


_BUFFERED_WEIGHTS_OK = [True]   # flipped off if this JAX build rejects pl.Buffered(1)


def bert_layer(x, bias3, p, *, num_heads, head_size, seq_tile, vmem_cap):
    if _BUFFERED_WEIGHTS_OK[0]:
        try:
            return _bert_layer_call(x, bias3, p, num_heads=num_heads, head_size=head_size,
                                    seq_tile=seq_tile, buffered_weights=True,
                                    vmem_cap=vmem_cap)
        except Exception:
            _BUFFERED_WEIGHTS_OK[0] = False   # fall back to default double-buffering
    return _bert_layer_call(x, bias3, p, num_heads=num_heads, head_size=head_size,
                            seq_tile=seq_tile, buffered_weights=False, vmem_cap=vmem_cap)


def pooler(x, w, b):
    B, S, H = x.shape
    rows = min(S, 8)                                     # sublane-aligned window holding CLS row
    return pl.pallas_call(
        pooler_kernel,
        grid=(1,),
        in_specs=[pl.BlockSpec((B, rows, H), lambda i: (0, 0, 0)),
                  pl.BlockSpec((H, H), lambda i: (0, 0)),
                  pl.BlockSpec((1, H), lambda i: (0, 0))],
        out_specs=pl.BlockSpec((B, H), lambda i: (0, 0)),
        out_shape=jax.ShapeDtypeStruct((B, H), jnp.float32),
    )(x, w, b)


# ------------------------------- model glue -------------------------------

def init_params(key, cfg):
    H = cfg["hidden_size"]
    I = cfg["intermediate_size"]
    V = cfg["vocab_size"]
    P = cfg["max_position_embeddings"]
    T = cfg["type_vocab_size"]
    L = cfg["num_hidden_layers"]
    std = cfg.get("initializer_range", 0.02)

    keys = iter(jax.random.split(key, 8 + 8 * L))

    def nrm(shape, dtype=jnp.float32):
        return (std * jax.random.normal(next(keys), shape)).astype(dtype)

    params = {
        "tok_emb": nrm((V, H)).at[0].set(0.0),   # padding_idx=0 zeroed at init (eval-only)
        "pos_emb": nrm((P, H)),
        "type_emb": nrm((T, H)),
        "ln_g": jnp.ones((1, H), jnp.float32),
        "ln_b": jnp.zeros((1, H), jnp.float32),
        "pool_w": nrm((H, H), jnp.bfloat16),
        "pool_b": jnp.zeros((1, H), jnp.float32),
        "layers": [],
    }
    for _ in range(L):
        lp = {
            "wq": nrm((H, H), jnp.bfloat16), "bq": jnp.zeros((1, H), jnp.float32),
            "wkv": nrm((H, 2 * H), jnp.bfloat16), "bkv": jnp.zeros((1, 2 * H), jnp.float32),
            "wo": nrm((H, H), jnp.bfloat16), "bo": jnp.zeros((1, H), jnp.float32),
            "ln1_g": jnp.ones((1, H), jnp.float32), "ln1_b": jnp.zeros((1, H), jnp.float32),
            "w1": nrm((H, I), jnp.bfloat16), "b1": jnp.zeros((1, I), jnp.float32),
            "w2": nrm((I, H), jnp.bfloat16), "b2": jnp.zeros((1, H), jnp.float32),
            "ln2_g": jnp.ones((1, H), jnp.float32), "ln2_b": jnp.zeros((1, H), jnp.float32),
        }
        params["layers"].append(lp)
    return params


def bert_forward(params, cfg, input_ids, attention_mask=None, token_type_ids=None):
    B, S = input_ids.shape
    H = cfg["hidden_size"]
    num_heads = cfg["num_attention_heads"]
    head_size = H // num_heads
    caps = _device_caps()

    position_ids = jnp.arange(S, dtype=jnp.int32)[None, :]
    if token_type_ids is None:
        token_type_ids = jnp.zeros_like(input_ids)
    if attention_mask is None:
        attention_mask = jnp.zeros_like(input_ids)

    # embedding gathers stay in XLA glue (data-dependent gather); LayerNorm is Pallas
    x = (jnp.take(params["tok_emb"], input_ids, axis=0)
         + jnp.take(params["pos_emb"], position_ids, axis=0)
         + jnp.take(params["type_emb"], token_type_ids, axis=0))
    x = embed_ln(x.astype(jnp.float32), params["ln_g"], params["ln_b"])
    # dropout is identity (eval mode)

    # reference masks scores where attention_mask == 1 -> precompute additive bias once
    bias3 = ((attention_mask == 1).astype(jnp.float32) * _MASK_VALUE).reshape(B, 1, S)

    # TODO(synk): cross-pallas_call prefetch of layer l+1's weights (P10) to hide the
    #             per-layer weight DMA prologue on v6e/v7x.
    # TODO(synk): optional bf16 inter-layer activations (halves activation HBM traffic).
    for lp in params["layers"]:
        x = bert_layer(x, bias3, lp, num_heads=num_heads, head_size=head_size,
                       seq_tile=caps["seq_tile"], vmem_cap=caps["vmem_cap"])

    pooled = pooler(x, params["pool_w"], params["pool_b"])
    return x, pooled


# ----------------------------------- main -----------------------------------

if __name__ == "__main__":
    cfg = dict(
        vocab_size=100,
        hidden_size=32,
        num_hidden_layers=2,
        num_attention_heads=4,
        intermediate_size=64,
        max_position_embeddings=64,
        type_vocab_size=2,
        initializer_range=0.02,
    )
    B, S = 2, 8

    key = jax.random.PRNGKey(0)
    kp, kid = jax.random.split(key)
    params = init_params(kp, cfg)

    input_ids = jax.random.randint(kid, (B, S), 1, cfg["vocab_size"], dtype=jnp.int32)
    # The reference module masks scores where attention_mask == 1, so zeros = attend everywhere.
    attention_mask = jnp.zeros((B, S), dtype=jnp.int32)

    x, pooled = bert_forward(params, cfg, input_ids, attention_mask)
    jax.block_until_ready((x, pooled))
    assert x.shape == (B, S, cfg["hidden_size"]) and pooled.shape == (B, cfg["hidden_size"])
    assert bool(jnp.all(jnp.isfinite(x))) and bool(jnp.all(jnp.isfinite(pooled)))
    print("KERNEL_OK")
</pallas_src>

<mosaic_0001>
module attributes {stable_mosaic.version = 11 : i64} {
  func.func @embed_ln_kernel(%arg0: i32, %arg1: memref<16x32xf32, #tpu.memory_space<vmem>>, %arg2: memref<1x32xf32, #tpu.memory_space<vmem>>, %arg3: memref<1x32xf32, #tpu.memory_space<vmem>>, %arg4: memref<16x32xf32, #tpu.memory_space<vmem>>) attributes {dimension_semantics = [#tpu.dimension_semantics<parallel>], iteration_bounds = array<i64: 1>, scalar_prefetch = 0 : i64, scratch_operands = 0 : i64, tpu.core_type = #tpu.core_type<tc>, window_params = [{transform_indices = @transform_0, window_bounds = array<i64: 16, 32>}, {pipeline_mode = #tpu.pipeline_mode<synchronous>, transform_indices = @transform_1, window_bounds = array<i64: 1, 32>}, {pipeline_mode = #tpu.pipeline_mode<synchronous>, transform_indices = @transform_2, window_bounds = array<i64: 1, 32>}, {transform_indices = @transform_3, window_bounds = array<i64: 16, 32>}]} {
    %c0 = arith.constant 0 : index
    %c0_0 = arith.constant 0 : index
    %0 = vector.load %arg1[%c0, %c0_0] : memref<16x32xf32, #tpu.memory_space<vmem>>, vector<16x32xf32>
    %c0_1 = arith.constant 0 : index
    %c0_2 = arith.constant 0 : index
    %1 = vector.load %arg2[%c0_1, %c0_2] : memref<1x32xf32, #tpu.memory_space<vmem>>, vector<1x32xf32>
    %c0_3 = arith.constant 0 : index
    %c0_4 = arith.constant 0 : index
    %2 = vector.load %arg3[%c0_3, %c0_4] : memref<1x32xf32, #tpu.memory_space<vmem>>, vector<1x32xf32>
    %cst = arith.constant dense<0.000000e+00> : vector<16xf32>
    %3 = vector.multi_reduction <add>, %0, %cst [1] : vector<16x32xf32> to vector<16xf32>
    %4 = vector.shape_cast %3 : vector<16xf32> to vector<16x1xf32>
    %cst_5 = arith.constant 3.200000e+01 : f32
    %5 = vector.broadcast %cst_5 : f32 to vector<16x1xf32>
    %6 = arith.divf %4, %5 : vector<16x1xf32>
    %7 = vector.broadcast %6 : vector<16x1xf32> to vector<16x32xf32>
    %8 = arith.subf %0, %7 : vector<16x32xf32>
    %9 = arith.mulf %8, %8 : vector<16x32xf32>
    %cst_6 = arith.constant dense<0.000000e+00> : vector<16xf32>
    %10 = vector.multi_reduction <add>, %9, %cst_6 [1] : vector<16x32xf32> to vector<16xf32>
    %11 = vector.shape_cast %10 : vector<16xf32> to vector<16x1xf32>
    %cst_7 = arith.constant 3.200000e+01 : f32
    %12 = vector.broadcast %cst_7 : f32 to vector<16x1xf32>
    %13 = arith.divf %11, %12 : vector<16x1xf32>
    %14 = vector.broadcast %6 : vector<16x1xf32> to vector<16x32xf32>
    %15 = arith.subf %0, %14 : vector<16x32xf32>
    %cst_8 = arith.constant 9.99999996E-13 : f32
    %16 = vector.broadcast %cst_8 : f32 to vector<16x1xf32>
    %17 = arith.addf %13, %16 : vector<16x1xf32>
    %18 = math.rsqrt %17 : vector<16x1xf32>
    %19 = vector.broadcast %18 : vector<16x1xf32> to vector<16x32xf32>
    %20 = arith.mulf %15, %19 : vector<16x32xf32>
    %21 = vector.broadcast %1 : vector<1x32xf32> to vector<16x32xf32>
    %22 = arith.mulf %20, %21 : vector<16x32xf32>
    %23 = vector.broadcast %2 : vector<1x32xf32> to vector<16x32xf32>
    %24 = arith.addf %22, %23 : vector<16x32xf32>
    %c0_9 = arith.constant 0 : index
    %c0_10 = arith.constant 0 : index
    %25 = vector.load %arg4[%c0_9, %c0_10] : memref<16x32xf32, #tpu.memory_space<vmem>>, vector<16x32xf32>
    tpu.vector_store %arg4[%c0_9, %c0_10], %24 {strides = array<i32>} : memref<16x32xf32, #tpu.memory_space<vmem>>, vector<16x32xf32>,
    return
  }
  func.func @transform_0(%arg0: i32) -> (i32, i32) {
    %c0_i32 = arith.constant 0 : i32
    %c0_i32_0 = arith.constant 0 : i32
    return %arg0, %c0_i32 : i32, i32
  }
  func.func @transform_1(%arg0: i32) -> (i32, i32) {
    %c0_i32 = arith.constant 0 : i32
    %c0_i32_0 = arith.constant 0 : i32
    %c0_i32_1 = arith.constant 0 : i32
    return %c0_i32, %c0_i32_0 : i32, i32
  }
  func.func @transform_2(%arg0: i32) -> (i32, i32) {
    %c0_i32 = arith.constant 0 : i32
    %c0_i32_0 = arith.constant 0 : i32
    %c0_i32_1 = arith.constant 0 : i32
    return %c0_i32, %c0_i32_0 : i32, i32
  }
  func.func @transform_3(%arg0: i32) -> (i32, i32) {
    %c0_i32 = arith.constant 0 : i32
    %c0_i32_0 = arith.constant 0 : i32
    return %arg0, %c0_i32 : i32, i32
  }
}

</mosaic_0001>

<bundles_post_ra>
// kernel: tpu_custom_call.1
= control target key start
LH: loop header
LB: loop body
LE: loop exit
PB: predicated region body
PF: predicated region fallthrough
CT: control target
= control target key end

     0   :  { %8 = vsyncpa [#allocation3], 0  ;;  %s220_s0 = inlined_call_operand.hbm [shape: f32[16,32], index: 0, kind: input, shape index: {}]   ;;  %s221_s1 = inlined_call_operand.vmem [shape: f32[1,32], index: 1, kind: input, shape index: {}]   ;;  %s222_s2 = inlined_call_operand.vmem [shape: f32[1,32], index: 2, kind: input, shape index: {}]   ;;  %s223_s3 = inlined_call_operand.hbm [shape: f32[16,32], index: 3, kind: output, shape index: {}]  }
   0x1   :  { %9 = vsyncpa [#allocation4], 0  ;;  %s154_s12 = smov [#allocation2]   ;;  %s106_s16 = scalar_lea.hbm %s220_s0, 256 }
   0x2   :  { %s15_s13 = sshll.u32 %s154_s12, 4  ;;  %p107_p0 = scmp.ne.s32.totalorder %s220_s0, %s106_s16  ;;  %s16_s13 = int_to_ptr.vmem [resolvable:$true] %s15_s13 }
   0x3   :  { %p110_p1 = scmp.lt.u32.totalorder %s106_s16, %s220_s0 }
   0x5   :  { %p112_p2 = pnand %p110_p1, %p107_p0 }
   0x7   :  { %115 = shalt.err (!%p112_p2)
}
   0x8   :  { %s116_s21 = scalar_lea.vmem %s16_s13, 256  ;;  %p121_p4 = scmp.lt.s32.totalorder %s16_s13, %s16_s13 }
   0x9   :  { %p117_p3 = scmp.ne.s32.totalorder %s16_s13, %s116_s21  ;;  %p122_p5 = scmp.lt.s32.totalorder %s116_s21, %s116_s21 }
   0xb   :  { %p123_p6 = por %p122_p5, %p121_p4 }
   0xd   :  { %p124_p7 = pnand %p123_p6, %p117_p3 }
   0xf   :  { %127 = shalt.err (!%p124_p7)
}
  0x10   :  { %s155_s22 = smov 128   ;;  %s156_s23 = smov 8  }
  0x11   :  { %21 = dma.hbm_to_vmem [thread:$0]  %s220_s0, 256, %s16_s13, [#allocation3], %s155_s22, %s155_s22, %s156_s23  }
  0x12   :  { %150 = dma.done.wait [#allocation3], 256  }
  0x13   :  { %151 = vsyncadd [#allocation3], 4294967040  ;;  %vm33_vm0 = vcmask 261120   ;;  %v29_v0 = vld [vmem:[#allocation2] sm:$0xff]  ;;  %v30_v1 = vld [vmem:[#allocation2 + $0x8] sm:$0xff]  ;;  %s157_s29 = smov [#allocation5]  }
  0x14   :  { %v34_v2 = vsel %vm33_vm0, %v29_v0, 0.0  ;;  %v37_v3 = vsel %vm33_vm0, %v30_v1, 0.0  ;;  %v96_v21 = vld [vmem:[%s221_s1] ss:$0 sm:$0xff]  ;;  %s84_s30 = sshll.u32 %s157_s29, 4  ;;  %s85_s30 = int_to_ptr.vmem [resolvable:$true] %s84_s30 }
  0x15   :  { %35 = vadd.xlane.f32.xlu0 %v34_v2  ;;  %v97_v23 = vld [vmem:[%s222_s2] ss:$0 sm:$0xff]  ;;  %s128_s4 = scalar_lea.vmem %s85_s30, 256  ;;  %p133_p9 = scmp.lt.s32.totalorder %s85_s30, %s85_s30 }
  0x16   :  { %p129_p8 = scmp.ne.s32.totalorder %s85_s30, %s128_s4  ;;  %p134_p10 = scmp.lt.s32.totalorder %s128_s4, %s128_s4 }
  0x18   :  { %p135_p11 = por %p134_p10, %p133_p9 }
  0x19   :  { %38 = vadd.xlane.f32.xlu0 %v37_v3 }
  0x1a   :  { %p136_p12 = pnand %p135_p11, %p129_p8 }
  0xa2   :  { %v36_v4 = vpop.xlane.xlu0 %35 }
  0xa3   :  { %v41_v5 = vmul.f32 0.03125, %v36_v4 }
  0xa5   :  { %v43_v6 = vsub.f32 %v29_v0, %v41_v5 }
  0xa6   :  { %v39_v7 = vpop.xlane.xlu0 %38 }
  0xa7   :  { %v42_v8 = vmul.f32 0.03125, %v39_v7  ;;  %v45_v9 = vmul.f32 %v43_v6, %v43_v6 }
  0xa9   :  { %v44_v10 = vsub.f32 %v30_v1, %v42_v8  ;;  %v47_v11 = vsel %vm33_vm0, %v45_v9, 0.0 }
  0xaa   :  { %48 = vadd.xlane.f32.xlu1 %v47_v11 }
  0xab   :  { %v46_v12 = vmul.f32 %v44_v10, %v44_v10 }
  0xad   :  { %v50_v13 = vsel %vm33_vm0, %v46_v12, 0.0 }
  0xae   :  { %51 = vadd.xlane.f32.xlu1 %v50_v13 }
 0x137   :  { %v49_v14 = vpop.xlane.xlu1 %48 }
 0x138   :  { %v53_v15 = vmul.f32 0.03125, %v49_v14 }
 0x13a   :  { %v55_v16 = vadd.f32 1e-12, %v53_v15 }
 0x13b   :  { %v52_v17 = vpop.xlane.xlu1 %51 }
 0x13c   :  { %102 = vrsqrt.f32 %v55_v16  ;;  %v54_v18 = vmul.f32 0.03125, %v52_v17 }
 0x13e   :  { %v56_v19 = vadd.f32 1e-12, %v54_v18 }
 0x140   :  { %104 = vrsqrt.f32 %v56_v19 }
 0x146   :  { %v103_v20 = vpop.eup %102 }
 0x147   :  { %v59_v22 = vmul.f32 %v103_v20, %v43_v6 }
 0x149   :  { %v67_v24 = vmul.f32 %v96_v21, %v59_v22 }
 0x14a   :  { %v105_v25 = vpop.eup %104 }
 0x14b   :  { %v60_v26 = vmul.f32 %v105_v25, %v44_v10  ;;  %v75_v27 = vadd.f32 %v97_v23, %v67_v24 }
 0x14d   :  { %v68_v28 = vmul.f32 %v96_v21, %v60_v26  ;;  %77 = vst.msk [vmem:[#allocation5] sm:$0xff] %vm33_vm0, %v75_v27 }
 0x14f   :  { %v76_v29 = vadd.f32 %v97_v23, %v68_v28 }
 0x151   :  { %78 = vst.msk [vmem:[#allocation5 + $0x8] sm:$0xff] %vm33_vm0, %v76_v29 }
 0x152   :  { %139 = shalt.err (!%p136_p12)
}
 0x153   :  { %s140_s5 = scalar_lea.hbm %s223_s3, 256 }
 0x154   :  { %p141_p13 = scmp.ne.s32.totalorder %s223_s3, %s140_s5  ;;  %p144_p0 = scmp.lt.u32.totalorder %s140_s5, %s223_s3 }
 0x156   :  { %p146_p1 = pnand %p144_p0, %p141_p13 }
 0x158   :  { %149 = shalt.err (!%p146_p1)
}
 0x159   :  { %90 = dma.vmem_to_hbm [thread:$0]  %s85_s30, 256, %s223_s3, [#allocation4], %s155_s22, %s155_s22, %s156_s23  }
 0x15a   :  { %152 = dma.done.wait [#allocation4], 256  }
 0x15b   :  { %153 = vsyncadd [#allocation4], 4294967040 }
 0x15c   :  { %94 = vsyncpa [#allocation3], 1 }
 0x15d   :  { %95 = vsyncpa [#allocation4], 1 }

</bundles_post_ra>
